<compile_context>
chip_gen: v7x
topology: tpu7x:2x2x1
jax: 0.10.0
libtpu: 0.0.40
codegen_flags: <defaults>
</compile_context>

<pallas_src>
import jax
import jax.numpy as jnp
from jax.experimental import pallas as pl
from jax.experimental.pallas import tpu as pltpu


def _round_up(n, m):
    return ((n + m - 1) // m) * m


def _cdiv(a, b):
    return (a + b - 1) // b


def mlp_kernel(x_ref,
               w1_ref, b1_ref,
               w2_ref, b2_ref,
               w3_ref, b3_ref,
               w4_ref, b4_ref,
               o_ref):
    """Fused forward pass for one (block, 1) batch tile."""
    cdt = w2_ref.dtype  # MXU operand dtype (bf16 fast path by default, f32 optional)

    # Layer 1 (1 -> 128): degenerate K=1 contraction -> VPU broadcast multiply,
    # keeps the MXU free for the layers that carry >99% of the FLOPs.
    h = x_ref[...] * w1_ref[...] + b1_ref[...]            # (bm,1)*(1,128) -> (bm,128) f32
    h = jnp.maximum(h, 0.0).astype(cdt)

    # Layers 2 (128 -> 512) and 3 (512 -> 256): the real MXU work.
    # bf16 operands, f32 accumulation; bias-add / ReLU stay in f32.
    h = jnp.dot(h, w2_ref[...], preferred_element_type=jnp.float32) + b2_ref[...]
    h = jnp.maximum(h, 0.0).astype(cdt)
    h = jnp.dot(h, w3_ref[...], preferred_element_type=jnp.float32) + b3_ref[...]
    h = jnp.maximum(h, 0.0)                                # (bm,256) f32

    # Layer 4 (256 -> 1): N=1 -> VPU multiply + lane reduction (XLU); f32 throughout.
    y = jnp.sum(h * w4_ref[...], axis=-1, keepdims=True) + b4_ref[...]   # (bm,1)
    o_ref[...] = y.astype(o_ref.dtype)


def prepare_params(params, *, use_bf16=True):
    """One-time parameter prep: transpose-free layout, hoisted bf16 casts.

    params: ((w1,b1),(w2,b2),(w3,b3),(w4,b4)) with w_i: (in, out), b_i: (1, out)
            (i.e. transposed relative to torch.nn.Linear.weight).
    Returns a flat tuple consumed by regression_model_forward. Casting w2/w3 to
    bf16 here (instead of inside the forward) makes it a one-time cost.
    """
    (w1, b1), (w2, b2), (w3, b3), (w4, b4) = params
    cdt = jnp.bfloat16 if use_bf16 else jnp.float32
    return (w1.astype(jnp.float32), b1.astype(jnp.float32),
            w2.astype(cdt), b2.astype(jnp.float32),
            w3.astype(cdt), b3.astype(jnp.float32),
            w4.reshape(1, -1).astype(jnp.float32), b4.astype(jnp.float32))


def regression_model_forward(x, prepared, *, bm=2048):
    """Forward pass of RegressionModel.

    x: (B, 1) float32.
    prepared: output of prepare_params(...).
    bm: max batch tile (rows per grid step). Default 2048 keeps per-tile compute
        well above the per-grid-step overhead while the live VMEM footprint stays
        under every generation's scoped default (incl. v7x's 64 MiB / 32 MiB scoped
        and v5e's 16 MiB scoped).
    """
    w1, b1, w2, b2, w3, b3, w4_row, b4 = prepared
    use_bf16 = (w2.dtype == jnp.bfloat16)
    x = x.astype(jnp.float32)
    B = x.shape[0]

    # bf16 vregs pack (16,128): round the batch tile to 16 rows; f32 only needs 8.
    row_align = 16 if use_bf16 else 8

    # Balanced tiling:
    #   * never pad a tiny batch all the way up to bm,
    #   * force >= 2 grid steps when possible so v7x's 2 TCs both get work
    #     (costs nothing on single-TC v5e/v6e),
    #   * balance tile sizes so B = k*bm + 1 doesn't pay for a nearly-empty tile.
    B_min = _round_up(B, row_align)
    num_tiles = _cdiv(B_min, bm)
    if num_tiles == 1 and B_min >= 2 * row_align:
        num_tiles = 2
    block = _round_up(_cdiv(B_min, num_tiles), row_align)
    B_pad = block * num_tiles
    if B_pad != B:
        x = jnp.pad(x, ((0, B_pad - B), (0, 0)))

    def full_spec(arr):
        # Whole (small) array resident for every batch tile. The index_map is
        # constant across the grid, so Pallas DMAs it once, not per step.
        return pl.BlockSpec(arr.shape, lambda i: (0,) * arr.ndim)

    out = pl.pallas_call(
        mlp_kernel,
        out_shape=jax.ShapeDtypeStruct((B_pad, 1), jnp.float32),
        grid_spec=pltpu.PrefetchScalarGridSpec(
            num_scalar_prefetch=0,
            grid=(num_tiles,),
            in_specs=[
                pl.BlockSpec((block, 1), lambda i: (i, 0)),
                full_spec(w1), full_spec(b1),
                full_spec(w2), full_spec(b2),
                full_spec(w3), full_spec(b3),
                full_spec(w4_row), full_spec(b4),
            ],
            out_specs=pl.BlockSpec((block, 1), lambda i: (i, 0)),
        ),
        compiler_params=pltpu.CompilerParams(
            dimension_semantics=("parallel",)),   # batch tiles shard across TCs (v7x)
    )(x, w1, b1, w2, b2, w3, b3, w4_row, b4)

    return out[:B]


def init_params(key):
    """Deterministic init mirroring the PyTorch Linear shapes:
       Linear(1,128), Linear(128,512), Linear(512,256), Linear(256,1)."""
    dims = [(1, 128), (128, 512), (512, 256), (256, 1)]
    params = []
    for (fan_in, fan_out) in dims:
        key, kw, kb = jax.random.split(key, 3)
        bound = 1.0 / jnp.sqrt(fan_in)
        w = jax.random.uniform(kw, (fan_in, fan_out), jnp.float32, -bound, bound)
        b = jax.random.uniform(kb, (1, fan_out), jnp.float32, -bound, bound)
        params.append((w, b))
    return tuple(params)


def reference_forward(x, params):
    h = x
    for i, (w, b) in enumerate(params):
        h = h @ w + b
        if i < len(params) - 1:
            h = jnp.maximum(h, 0.0)
    return h


if __name__ == "__main__":
    key = jax.random.PRNGKey(0)
    key, kx = jax.random.split(key)
    params = init_params(key)

    prepared_bf16 = prepare_params(params, use_bf16=True)    # default / fast path
    prepared_f32 = prepare_params(params, use_bf16=False)    # exact path

    # 1) Small batch exactly like the module's usage: (batch_size x 1), f32 path.
    B = 8
    x = jax.random.uniform(kx, (B, 1), jnp.float32, -2.0 * jnp.pi, 2.0 * jnp.pi)
    y = jax.block_until_ready(regression_model_forward(x, prepared_f32))
    y_ref = reference_forward(x, params)
    assert y.shape == (B, 1)
    assert jnp.allclose(y, y_ref, atol=1e-5, rtol=1e-5)

    # 2) Batch not divisible by the tile -> padding + balanced multi-step grid
    #    (>= 2 parallel steps), default bf16 MXU operands, f32 accumulation.
    key, kx2 = jax.random.split(key)
    B2 = 300
    x2 = jax.random.uniform(kx2, (B2, 1), jnp.float32, -2.0 * jnp.pi, 2.0 * jnp.pi)
    y2_ref = reference_forward(x2, params)

    y2_bf16 = jax.block_until_ready(regression_model_forward(x2, prepared_bf16))
    assert y2_bf16.shape == (B2, 1)
    assert jnp.allclose(y2_bf16, y2_ref, atol=5e-2, rtol=5e-2)

    # Same batch with a small explicit tile (exercises multi-tile grid, bf16 path).
    y2_small = jax.block_until_ready(
        regression_model_forward(x2, prepared_bf16, bm=128))
    assert jnp.allclose(y2_small, y2_ref, atol=5e-2, rtol=5e-2)

    # 3) f32-operand path on the multi-tile grid, tight tolerance.
    y2_f32 = jax.block_until_ready(regression_model_forward(x2, prepared_f32))
    assert jnp.allclose(y2_f32, y2_ref, atol=1e-5, rtol=1e-5)

    print("KERNEL_OK")
</pallas_src>

<mosaic_0001>
module attributes {stable_mosaic.version = 11 : i64} {
  func.func @mlp_kernel(%arg0: i32, %arg1: memref<8x1xf32, #tpu.memory_space<vmem>>, %arg2: memref<1x128xf32, #tpu.memory_space<vmem>>, %arg3: memref<1x128xf32, #tpu.memory_space<vmem>>, %arg4: memref<128x512xf32, #tpu.memory_space<vmem>>, %arg5: memref<1x512xf32, #tpu.memory_space<vmem>>, %arg6: memref<512x256xf32, #tpu.memory_space<vmem>>, %arg7: memref<1x256xf32, #tpu.memory_space<vmem>>, %arg8: memref<1x256xf32, #tpu.memory_space<vmem>>, %arg9: memref<1x1xf32, #tpu.memory_space<vmem>>, %arg10: memref<8x1xf32, #tpu.memory_space<vmem>>) attributes {dimension_semantics = [#tpu.dimension_semantics<parallel>], iteration_bounds = array<i64: 1>, scalar_prefetch = 0 : i64, scratch_operands = 0 : i64, tpu.core_type = #tpu.core_type<tc>, window_params = [{transform_indices = @transform_0, window_bounds = array<i64: 8, 1>}, {pipeline_mode = #tpu.pipeline_mode<synchronous>, transform_indices = @transform_1, window_bounds = array<i64: 1, 128>}, {pipeline_mode = #tpu.pipeline_mode<synchronous>, transform_indices = @transform_2, window_bounds = array<i64: 1, 128>}, {pipeline_mode = #tpu.pipeline_mode<synchronous>, transform_indices = @transform_3, window_bounds = array<i64: 128, 512>}, {pipeline_mode = #tpu.pipeline_mode<synchronous>, transform_indices = @transform_4, window_bounds = array<i64: 1, 512>}, {pipeline_mode = #tpu.pipeline_mode<synchronous>, transform_indices = @transform_5, window_bounds = array<i64: 512, 256>}, {pipeline_mode = #tpu.pipeline_mode<synchronous>, transform_indices = @transform_6, window_bounds = array<i64: 1, 256>}, {pipeline_mode = #tpu.pipeline_mode<synchronous>, transform_indices = @transform_7, window_bounds = array<i64: 1, 256>}, {pipeline_mode = #tpu.pipeline_mode<synchronous>, transform_indices = @transform_8, window_bounds = array<i64: 1, 1>}, {transform_indices = @transform_9, window_bounds = array<i64: 8, 1>}]} {
    %c0 = arith.constant 0 : index
    %c0_0 = arith.constant 0 : index
    %0 = vector.load %arg1[%c0, %c0_0] : memref<8x1xf32, #tpu.memory_space<vmem>>, vector<8x1xf32>
    %c0_1 = arith.constant 0 : index
    %c0_2 = arith.constant 0 : index
    %1 = vector.load %arg2[%c0_1, %c0_2] : memref<1x128xf32, #tpu.memory_space<vmem>>, vector<1x128xf32>
    %2 = vector.broadcast %0 : vector<8x1xf32> to vector<8x128xf32>
    %3 = vector.broadcast %1 : vector<1x128xf32> to vector<8x128xf32>
    %4 = arith.mulf %2, %3 : vector<8x128xf32>
    %c0_3 = arith.constant 0 : index
    %c0_4 = arith.constant 0 : index
    %5 = vector.load %arg3[%c0_3, %c0_4] : memref<1x128xf32, #tpu.memory_space<vmem>>, vector<1x128xf32>
    %6 = vector.broadcast %5 : vector<1x128xf32> to vector<8x128xf32>
    %7 = arith.addf %4, %6 : vector<8x128xf32>
    %cst = arith.constant 0.000000e+00 : f32
    %8 = vector.broadcast %cst : f32 to vector<8x128xf32>
    %9 = arith.maximumf %7, %8 : vector<8x128xf32>
    %c0_5 = arith.constant 0 : index
    %c0_6 = arith.constant 0 : index
    %10 = vector.load %arg4[%c0_5, %c0_6] : memref<128x512xf32, #tpu.memory_space<vmem>>, vector<128x512xf32>
    %cst_7 = arith.constant dense<0.000000e+00> : vector<8x512xf32>
    %11 = tpu.matmul %9, %10, %cst_7 {dimension_numbers = #tpu.dot_dimension_numbers<[1], [0], [0], [1], [0, 0, 1, 1], [], []>} : vector<8x128xf32>, vector<128x512xf32>, vector<8x512xf32> -> vector<8x512xf32>
    %c0_8 = arith.constant 0 : index
    %c0_9 = arith.constant 0 : index
    %12 = vector.load %arg5[%c0_8, %c0_9] : memref<1x512xf32, #tpu.memory_space<vmem>>, vector<1x512xf32>
    %13 = vector.broadcast %12 : vector<1x512xf32> to vector<8x512xf32>
    %14 = arith.addf %11, %13 : vector<8x512xf32>
    %cst_10 = arith.constant 0.000000e+00 : f32
    %15 = vector.broadcast %cst_10 : f32 to vector<8x512xf32>
    %16 = arith.maximumf %14, %15 : vector<8x512xf32>
    %c0_11 = arith.constant 0 : index
    %c0_12 = arith.constant 0 : index
    %17 = vector.load %arg6[%c0_11, %c0_12] : memref<512x256xf32, #tpu.memory_space<vmem>>, vector<512x256xf32>
    %cst_13 = arith.constant dense<0.000000e+00> : vector<8x256xf32>
    %18 = tpu.matmul %16, %17, %cst_13 {dimension_numbers = #tpu.dot_dimension_numbers<[1], [0], [0], [1], [0, 0, 1, 1], [], []>} : vector<8x512xf32>, vector<512x256xf32>, vector<8x256xf32> -> vector<8x256xf32>
    %c0_14 = arith.constant 0 : index
    %c0_15 = arith.constant 0 : index
    %19 = vector.load %arg7[%c0_14, %c0_15] : memref<1x256xf32, #tpu.memory_space<vmem>>, vector<1x256xf32>
    %20 = vector.broadcast %19 : vector<1x256xf32> to vector<8x256xf32>
    %21 = arith.addf %18, %20 : vector<8x256xf32>
    %cst_16 = arith.constant 0.000000e+00 : f32
    %22 = vector.broadcast %cst_16 : f32 to vector<8x256xf32>
    %23 = arith.maximumf %21, %22 : vector<8x256xf32>
    %c0_17 = arith.constant 0 : index
    %c0_18 = arith.constant 0 : index
    %24 = vector.load %arg8[%c0_17, %c0_18] : memref<1x256xf32, #tpu.memory_space<vmem>>, vector<1x256xf32>
    %25 = vector.broadcast %24 : vector<1x256xf32> to vector<8x256xf32>
    %26 = arith.mulf %23, %25 : vector<8x256xf32>
    %cst_19 = arith.constant dense<0.000000e+00> : vector<8xf32>
    %27 = vector.multi_reduction <add>, %26, %cst_19 [1] : vector<8x256xf32> to vector<8xf32>
    %28 = vector.shape_cast %27 : vector<8xf32> to vector<8x1xf32>
    %c0_20 = arith.constant 0 : index
    %c0_21 = arith.constant 0 : index
    %29 = vector.load %arg9[%c0_20, %c0_21] : memref<1x1xf32, #tpu.memory_space<vmem>>, vector<1x1xf32>
    %30 = vector.broadcast %29 : vector<1x1xf32> to vector<8x1xf32>
    %31 = arith.addf %28, %30 : vector<8x1xf32>
    %c0_22 = arith.constant 0 : index
    %c0_23 = arith.constant 0 : index
    %32 = vector.load %arg10[%c0_22, %c0_23] : memref<8x1xf32, #tpu.memory_space<vmem>>, vector<8x1xf32>
    tpu.vector_store %arg10[%c0_22, %c0_23], %31 {strides = array<i32>} : memref<8x1xf32, #tpu.memory_space<vmem>>, vector<8x1xf32>,
    return
  }
  func.func @transform_0(%arg0: i32) -> (i32, i32) {
    %c0_i32 = arith.constant 0 : i32
    %c0_i32_0 = arith.constant 0 : i32
    return %arg0, %c0_i32 : i32, i32
  }
  func.func @transform_1(%arg0: i32) -> (i32, i32) {
    %c0_i32 = arith.constant 0 : i32
    %c0_i32_0 = arith.constant 0 : i32
    %c0_i32_1 = arith.constant 0 : i32
    return %c0_i32, %c0_i32_0 : i32, i32
  }
  func.func @transform_2(%arg0: i32) -> (i32, i32) {
    %c0_i32 = arith.constant 0 : i32
    %c0_i32_0 = arith.constant 0 : i32
    %c0_i32_1 = arith.constant 0 : i32
    return %c0_i32, %c0_i32_0 : i32, i32
  }
  func.func @transform_3(%arg0: i32) -> (i32, i32) {
    %c0_i32 = arith.constant 0 : i32
    %c0_i32_0 = arith.constant 0 : i32
    %c0_i32_1 = arith.constant 0 : i32
    return %c0_i32, %c0_i32_0 : i32, i32
  }
  func.func @transform_4(%arg0: i32) -> (i32, i32) {
    %c0_i32 = arith.constant 0 : i32
    %c0_i32_0 = arith.constant 0 : i32
    %c0_i32_1 = arith.constant 0 : i32
    return %c0_i32, %c0_i32_0 : i32, i32
  }
  func.func @transform_5(%arg0: i32) -> (i32, i32) {
    %c0_i32 = arith.constant 0 : i32
    %c0_i32_0 = arith.constant 0 : i32
    %c0_i32_1 = arith.constant 0 : i32
    return %c0_i32, %c0_i32_0 : i32, i32
  }
  func.func @transform_6(%arg0: i32) -> (i32, i32) {
    %c0_i32 = arith.constant 0 : i32
    %c0_i32_0 = arith.constant 0 : i32
    %c0_i32_1 = arith.constant 0 : i32
    return %c0_i32, %c0_i32_0 : i32, i32
  }
  func.func @transform_7(%arg0: i32) -> (i32, i32) {
    %c0_i32 = arith.constant 0 : i32
    %c0_i32_0 = arith.constant 0 : i32
    %c0_i32_1 = arith.constant 0 : i32
    return %c0_i32, %c0_i32_0 : i32, i32
  }
  func.func @transform_8(%arg0: i32) -> (i32, i32) {
    %c0_i32 = arith.constant 0 : i32
    %c0_i32_0 = arith.constant 0 : i32
    %c0_i32_1 = arith.constant 0 : i32
    return %c0_i32, %c0_i32_0 : i32, i32
  }
  func.func @transform_9(%arg0: i32) -> (i32, i32) {
    %c0_i32 = arith.constant 0 : i32
    %c0_i32_0 = arith.constant 0 : i32
    return %arg0, %c0_i32 : i32, i32
  }
}

</mosaic_0001>

<bundles_post_ra>
// kernel: tpu_custom_call.1
= control target key start
LH: loop header
LB: loop body
LE: loop exit
PB: predicated region body
PF: predicated region fallthrough
CT: control target
= control target key end

     0   :  { %s996_s0 = inlined_call_operand.vmem [shape: f32[8,1], index: 0, kind: input, shape index: {}]   ;;  %s997_s1 = inlined_call_operand.vmem [shape: f32[1,128], index: 1, kind: input, shape index: {}]   ;;  %s998_s2 = inlined_call_operand.vmem [shape: f32[1,128], index: 2, kind: input, shape index: {}]   ;;  %s999_s3 = inlined_call_operand.hbm [shape: f32[128,512], index: 3, kind: input, shape index: {}]   ;;  %s1000_s4 = inlined_call_operand.vmem [shape: f32[1,512], index: 4, kind: input, shape index: {}]   ;;  %s1001_s5 = inlined_call_operand.hbm [shape: f32[512,256], index: 5, kind: input, shape index: {}]   ;;  %s1002_s6 = inlined_call_operand.vmem [shape: f32[1,256], index: 6, kind: input, shape index: {}]   ;;  %s1003_s7 = inlined_call_operand.vmem [shape: f32[1,256], index: 7, kind: input, shape index: {}]   ;;  %s1004_s8 = inlined_call_operand.<no memory space> [shape: f32[1,1], index: 8, kind: input, shape index: {}]   ;;  %s1005_s9 = inlined_call_operand.vmem [shape: f32[8,1], index: 9, kind: output, shape index: {}]  }
   0x1   :  { %v14_v0 = vstv %s1004_s8 }
   0x2   :  { %15 = vst [vmem:[#allocation2] sm:$0x1] %v14_v0 }
   0x3   :  { %16 = vsyncpa [#allocation4], 0 }
   0x4   :  { %17 = vsyncpa [#allocation6], 0  ;;  %s890_s11 = smov [#allocation3]   ;;  %s842_s15 = scalar_lea.hbm %s999_s3, 8192 }
   0x5   :  { %s29_s12 = sshll.u32 %s890_s11, 4  ;;  %p843_p0 = scmp.ne.s32.totalorder %s999_s3, %s842_s15  ;;  %s30_s12 = int_to_ptr.vmem [resolvable:$true] %s29_s12 }
   0x6   :  { %p846_p1 = scmp.lt.u32.totalorder %s842_s15, %s999_s3 }
   0x8   :  { %p848_p2 = pnand %p846_p1, %p843_p0 }
   0xa   :  { %851 = shalt.err (!%p848_p2)
}
   0xb   :  { %s852_s8 = scalar_lea.vmem %s30_s12, 8192  ;;  %p857_p4 = scmp.lt.s32.totalorder %s30_s12, %s30_s12 }
   0xc   :  { %p853_p3 = scmp.ne.s32.totalorder %s30_s12, %s852_s8  ;;  %p858_p5 = scmp.lt.s32.totalorder %s852_s8, %s852_s8 }
   0xe   :  { %p859_p6 = por %p858_p5, %p857_p4 }
  0x10   :  { %p860_p7 = pnand %p859_p6, %p853_p3 }
  0x12   :  { %863 = shalt.err (!%p860_p7)
}
  0x13   :  { %s891_s20 = smov 512   ;;  %s892_s21 = smov 32  }
  0x14   :  { %35 = dma.hbm_to_vmem [thread:$0]  %s999_s3, 8192, %s30_s12, [#allocation4], %s891_s20, %s891_s20, %s892_s21  }
  0x15   :  { %s893_s24 = smov [#allocation5]   ;;  %s864_s28 = scalar_lea.hbm %s1001_s5, 16384 }
  0x16   :  { %s43_s25 = sshll.u32 %s893_s24, 4  ;;  %p865_p8 = scmp.ne.s32.totalorder %s1001_s5, %s864_s28  ;;  %s44_s25 = int_to_ptr.vmem [resolvable:$true] %s43_s25 }
  0x17   :  { %p868_p9 = scmp.lt.u32.totalorder %s864_s28, %s1001_s5 }
  0x19   :  { %p870_p10 = pnand %p868_p9, %p865_p8 }
  0x1b   :  { %873 = shalt.err (!%p870_p10)
}
  0x1c   :  { %s874_s13 = scalar_lea.vmem %s44_s25, 16384  ;;  %p879_p12 = scmp.lt.s32.totalorder %s44_s25, %s44_s25 }
  0x1d   :  { %p875_p11 = scmp.ne.s32.totalorder %s44_s25, %s874_s13  ;;  %p880_p13 = scmp.lt.s32.totalorder %s874_s13, %s874_s13 }
  0x1f   :  { %p881_p0 = por %p880_p13, %p879_p12 }
  0x21   :  { %p882_p1 = pnand %p881_p0, %p875_p11 }
  0x23   :  { %885 = shalt.err (!%p882_p1)
}
  0x24   :  { %s894_s3 = smov 256   ;;  %s895_s12 = smov 16  }
  0x25   :  { %49 = dma.hbm_to_vmem [thread:$0]  %s1001_s5, 16384, %s44_s25, [#allocation6], %s894_s3, %s894_s3, %s895_s12  }
  0x26   :  { %886 = dma.done.wait [#allocation4], 8192  }
  0x27   :  { %887 = vsyncadd [#allocation4], 4294959104 }
  0x28   :  { %888 = dma.done.wait [#allocation6], 16384  }
  0x29   :  { %889 = vsyncadd [#allocation6], 4294950912  ;;  %v896_v1 = vmov 0   ;;  %v62_v2 = vld [vmem:[%s996_s0] sm:$0xff]  ;;  %v86_v3 = vld [vmem:[#allocation3 + $0x8] sm:$0xff]  ;;  %v897_v31 = vmov 0.0  }
  0x2a   :  { %841 = vset.pattern.permute.xlu0 %v896_v1  ;;  %v90_v4 = vld [vmem:[#allocation3 + $0x28] sm:$0xff]  ;;  %v88_v6 = vld [vmem:[#allocation3 + $0x18] sm:$0xff]  ;;  %v85_v8 = vld [vmem:[#allocation3] sm:$0xff]  ;;  %235 = vmatprep.mubr.f32.mxu0 %v897_v31  ;;  %vm626_vm0 = vcmask 7168  }
  0x2b   :  { %66 = vperm.xlu0 %841, %v62_v2   ;;  %v637_v5 = vpack.c.bf16 %v90_v4, %v86_v3  ;;  %v92_v7 = vld [vmem:[#allocation3 + $0x38] sm:$0xff]  ;;  %v89_v10 = vld [vmem:[#allocation3 + $0x20] sm:$0xff]  ;;  %v87_v11 = vld [vmem:[#allocation3 + $0x10] sm:$0xff]  ;;  %306 = vmatprep.mubr.f32.mxu1 %v897_v31 }
  0x2c   :  { %v669_v9 = vpack.c.bf16 %v92_v7, %v88_v6  ;;  %v91_v12 = vld [vmem:[#allocation3 + $0x30] sm:$0xff]  ;;  %v639_v13 = vpack.c.bf16 %v89_v10, %v85_v8  ;;  %v94_v15 = vld [vmem:[#allocation3 + $0x48] sm:$0xff]  ;;  %v96_v17 = vld [vmem:[#allocation3 + $0x58] sm:$0xff] }
  0x2d   :  { %638 = vmatprep.subr.bf16.mxu0 %v637_v5  ;;  %v671_v14 = vpack.c.bf16 %v91_v12, %v87_v11  ;;  %v98_v16 = vld [vmem:[#allocation3 + $0x68] sm:$0xff]  ;;  %v100_v19 = vld [vmem:[#allocation3 + $0x78] sm:$0xff]  ;;  %v93_v20 = vld [vmem:[#allocation3 + $0x40] sm:$0xff] }
  0x2e   :  { %670 = vmatprep.subr.bf16.mxu1 %v669_v9  ;;  %v641_v18 = vpack.c.bf16 %v98_v16, %v94_v15  ;;  %v97_v21 = vld [vmem:[#allocation3 + $0x60] sm:$0xff]  ;;  %640 = vmatpush1.bf16.msra.mxu0 %v639_v13  ;;  %v673_v22 = vpack.c.bf16 %v100_v19, %v96_v17  ;;  %v95_v24 = vld [vmem:[#allocation3 + $0x50] sm:$0xff]  ;;  %v102_v26 = vld [vmem:[#allocation3 + $0x88] sm:$0xff] }
  0x2f   :  { %672 = vmatpush1.bf16.msra.mxu1 %v671_v14  ;;  %v643_v23 = vpack.c.bf16 %v97_v21, %v93_v20  ;;  %v99_v25 = vld [vmem:[#allocation3 + $0x70] sm:$0xff]  ;;  %v106_v28 = vld [vmem:[#allocation3 + $0xa8] sm:$0xff]  ;;  %v104_v29 = vld [vmem:[#allocation3 + $0x98] sm:$0xff] }
  0x30   :  { %642 = vmatprep.subr.bf16.mxu0 %v641_v18  ;;  %v675_v27 = vpack.c.bf16 %v99_v25, %v95_v24  ;;  %v108_v30 = vld [vmem:[#allocation3 + $0xb8] sm:$0xff]  ;;  %674 = vmatprep.subr.bf16.mxu1 %v673_v22  ;;  %v645_v32 = vpack.c.bf16 %v106_v28, %v102_v26  ;;  %v101_v34 = vld [vmem:[#allocation3 + $0x80] sm:$0xff]  ;;  %v103_v36 = vld [vmem:[#allocation3 + $0x90] sm:$0xff] }
  0x31   :  { %v677_v33 = vpack.c.bf16 %v108_v30, %v104_v29  ;;  %v105_v35 = vld [vmem:[#allocation3 + $0xa0] sm:$0xff]  ;;  %v107_v37 = vld [vmem:[#allocation3 + $0xb0] sm:$0xff]  ;;  %v110_v38 = vld [vmem:[#allocation3 + $0xc8] sm:$0xff] }
  0x32   :  { %v114_v39 = vld [vmem:[#allocation3 + $0xe8] sm:$0xff]  ;;  %644 = vmatpush1.bf16.msra.mxu0 %v643_v23  ;;  %v647_v40 = vpack.c.bf16 %v105_v35, %v101_v34  ;;  %v679_v41 = vpack.c.bf16 %v107_v37, %v103_v36  ;;  %v112_v42 = vld [vmem:[#allocation3 + $0xd8] sm:$0xff]  ;;  %v109_v44 = vld [vmem:[#allocation3 + $0xc0] sm:$0xff] }
  0x33   :  { %676 = vmatpush1.bf16.msra.mxu1 %v675_v27  ;;  %v116_v43 = vld [vmem:[#allocation3 + $0xf8] sm:$0xff]  ;;  %646 = vmatprep.subr.bf16.mxu0 %v645_v32  ;;  %v649_v45 = vpack.c.bf16 %v114_v39, %v110_v38  ;;  %v113_v47 = vld [vmem:[#allocation3 + $0xe0] sm:$0xff]  ;;  %v111_v48 = vld [vmem:[#allocation3 + $0xd0] sm:$0xff] }
  0x34   :  { %678 = vmatprep.subr.bf16.mxu1 %v677_v33  ;;  %v681_v46 = vpack.c.bf16 %v116_v43, %v112_v42  ;;  %v115_v49 = vld [vmem:[#allocation3 + $0xf0] sm:$0xff]  ;;  %v118_v50 = vld [vmem:[#allocation3 + $0x108] sm:$0xff]  ;;  %v120_v52 = vld [vmem:[#allocation3 + $0x118] sm:$0xff]  ;;  %v651_v54 = vpack.c.bf16 %v113_v47, %v109_v44 }
  0x35   :  { %v122_v51 = vld [vmem:[#allocation3 + $0x128] sm:$0xff]  ;;  %v124_v53 = vld [vmem:[#allocation3 + $0x138] sm:$0xff]  ;;  %v683_v55 = vpack.c.bf16 %v115_v49, %v111_v48  ;;  %v117_v56 = vld [vmem:[#allocation3 + $0x100] sm:$0xff] }
  0x36   :  { %648 = vmatpush1.bf16.msra.mxu0 %v647_v40  ;;  %v121_v57 = vld [vmem:[#allocation3 + $0x120] sm:$0xff]  ;;  %v653_v58 = vpack.c.bf16 %v122_v51, %v118_v50  ;;  %v685_v59 = vpack.c.bf16 %v124_v53, %v120_v52  ;;  %v119_v60 = vld [vmem:[#allocation3 + $0x110] sm:$0xff]  ;;  %v126_v62 = vld [vmem:[#allocation3 + $0x148] sm:$0xff] }
  0x37   :  { %680 = vmatpush1.bf16.msra.mxu1 %v679_v41  ;;  %650 = vmatprep.subr.bf16.mxu0 %v649_v45  ;;  %v123_v61 = vld [vmem:[#allocation3 + $0x130] sm:$0xff]  ;;  %v130_v63 = vld [vmem:[#allocation3 + $0x168] sm:$0xff]  ;;  %v128_v0 = vld [vmem:[#allocation3 + $0x158] sm:$0xff]  ;;  %v655_v2 = vpack.c.bf16 %v121_v57, %v117_v56 }
  0x38   :  { %682 = vmatprep.subr.bf16.mxu1 %v681_v46  ;;  %v132_v1 = vld [vmem:[#allocation3 + $0x178] sm:$0xff]  ;;  %v687_v3 = vpack.c.bf16 %v123_v61, %v119_v60  ;;  %v125_v4 = vld [vmem:[#allocation3 + $0x140] sm:$0xff]  ;;  %v657_v6 = vpack.c.bf16 %v130_v63, %v126_v62  ;;  %v127_v8 = vld [vmem:[#allocation3 + $0x150] sm:$0xff] }
  0x39   :  { %v129_v5 = vld [vmem:[#allocation3 + $0x160] sm:$0xff]  ;;  %v689_v7 = vpack.c.bf16 %v132_v1, %v128_v0  ;;  %v131_v9 = vld [vmem:[#allocation3 + $0x170] sm:$0xff]  ;;  %v134_v10 = vld [vmem:[#allocation3 + $0x188] sm:$0xff] }
  0x3a   :  { %652 = vmatpush1.bf16.msra.mxu0 %v651_v54  ;;  %v138_v11 = vld [vmem:[#allocation3 + $0x1a8] sm:$0xff]  ;;  %v136_v12 = vld [vmem:[#allocation3 + $0x198] sm:$0xff]  ;;  %v659_v14 = vpack.c.bf16 %v129_v5, %v125_v4  ;;  %v691_v15 = vpack.c.bf16 %v131_v9, %v127_v8  ;;  %v133_v16 = vld [vmem:[#allocation3 + $0x180] sm:$0xff] }
  0x3b   :  { %684 = vmatpush1.bf16.msra.mxu1 %v683_v55  ;;  %654 = vmatprep.subr.bf16.mxu0 %v653_v58  ;;  %v140_v13 = vld [vmem:[#allocation3 + $0x1b8] sm:$0xff]  ;;  %v137_v17 = vld [vmem:[#allocation3 + $0x1a0] sm:$0xff]  ;;  %v661_v18 = vpack.c.bf16 %v138_v11, %v134_v10  ;;  %v135_v20 = vld [vmem:[#allocation3 + $0x190] sm:$0xff] }
  0x3c   :  { %686 = vmatprep.subr.bf16.mxu1 %v685_v59  ;;  %v693_v19 = vpack.c.bf16 %v140_v13, %v136_v12  ;;  %v139_v21 = vld [vmem:[#allocation3 + $0x1b0] sm:$0xff]  ;;  %v142_v22 = vld [vmem:[#allocation3 + $0x1c8] sm:$0xff]  ;;  %v144_v24 = vld [vmem:[#allocation3 + $0x1d8] sm:$0xff]  ;;  %v663_v26 = vpack.c.bf16 %v137_v17, %v133_v16 }
  0x3d   :  { %v146_v23 = vld [vmem:[#allocation3 + $0x1e8] sm:$0xff]  ;;  %v148_v25 = vld [vmem:[#allocation3 + $0x1f8] sm:$0xff]  ;;  %v695_v27 = vpack.c.bf16 %v139_v21, %v135_v20  ;;  %v141_v28 = vld [vmem:[#allocation3 + $0x1c0] sm:$0xff] }
  0x3e   :  { %656 = vmatpush1.bf16.msra.mxu0 %v655_v2  ;;  %v145_v29 = vld [vmem:[#allocation3 + $0x1e0] sm:$0xff]  ;;  %v665_v30 = vpack.c.bf16 %v146_v23, %v142_v22  ;;  %v697_v31 = vpack.c.bf16 %v148_v25, %v144_v24  ;;  %v143_v32 = vld [vmem:[#allocation3 + $0x1d0] sm:$0xff]  ;;  %v318_v34 = vld [vmem:[#allocation5 + $0x8] sm:$0xff] }
  0x3f   :  { %688 = vmatpush1.bf16.msra.mxu1 %v687_v3  ;;  %658 = vmatprep.subr.bf16.mxu0 %v657_v6  ;;  %v147_v33 = vld [vmem:[#allocation3 + $0x1f0] sm:$0xff]  ;;  %v320_v35 = vld [vmem:[#allocation5 + $0x18] sm:$0xff]  ;;  %v382_v36 = vld [vmem:[#allocation5 + $0x208] sm:$0xff]  ;;  %v667_v38 = vpack.c.bf16 %v145_v29, %v141_v28 }
  0x40   :  { %690 = vmatprep.subr.bf16.mxu1 %v689_v7  ;;  %v384_v37 = vld [vmem:[#allocation5 + $0x218] sm:$0xff]  ;;  %v699_v39 = vpack.c.bf16 %v147_v33, %v143_v32  ;;  %v701_v40 = vpack.c.bf16 %v320_v35, %v318_v34  ;;  %v317_v45 = vld [vmem:[#allocation5] sm:$0xff]  ;;  %v319_v46 = vld [vmem:[#allocation5 + $0x10] sm:$0xff] }
  0x41   :  { %v765_v41 = vpack.c.bf16 %v384_v37, %v382_v36  ;;  %v634_v42 = vld [vmem:[%s997_s1] ss:$0 sm:$0xff]  ;;  %v381_v48 = vld [vmem:[#allocation5 + $0x200] sm:$0xff]  ;;  %v383_v49 = vld [vmem:[#allocation5 + $0x210] sm:$0xff]  ;;  %v703_v55 = vpack.c.bf16 %v319_v46, %v317_v45 }
  0x42   :  { %660 = vmatpush1.bf16.msra.mxu0 %v659_v14  ;;  %v635_v43 = vld [vmem:[%s998_s2] ss:$0 sm:$0xff]  ;;  %v322_v50 = vld [vmem:[#allocation5 + $0x28] sm:$0xff]  ;;  %v767_v56 = vpack.c.bf16 %v383_v49, %v381_v48  ;;  %v321_v57 = vld [vmem:[#allocation5 + $0x20] sm:$0xff] }
  0x43   :  { %692 = vmatpush1.bf16.msra.mxu1 %v691_v15  ;;  %662 = vmatprep.subr.bf16.mxu0 %v661_v18  ;;  %v324_v51 = vld [vmem:[#allocation5 + $0x38] sm:$0xff]  ;;  %v386_v52 = vld [vmem:[#allocation5 + $0x228] sm:$0xff]  ;;  %v323_v58 = vld [vmem:[#allocation5 + $0x30] sm:$0xff] }
  0x44   :  { %694 = vmatprep.subr.bf16.mxu1 %v693_v19  ;;  %v388_v53 = vld [vmem:[#allocation5 + $0x238] sm:$0xff]  ;;  %v705_v60 = vpack.c.bf16 %v324_v51, %v322_v50  ;;  %v385_v62 = vld [vmem:[#allocation5 + $0x220] sm:$0xff]  ;;  %v387_v63 = vld [vmem:[#allocation5 + $0x230] sm:$0xff]  ;;  %v707_v4 = vpack.c.bf16 %v323_v58, %v321_v57 }
  0x45   :  { %v769_v61 = vpack.c.bf16 %v388_v53, %v386_v52  ;;  %v326_v0 = vld [vmem:[#allocation5 + $0x48] sm:$0xff]  ;;  %v328_v1 = vld [vmem:[#allocation5 + $0x58] sm:$0xff]  ;;  %v771_v5 = vpack.c.bf16 %v387_v63, %v385_v62  ;;  %v325_v6 = vld [vmem:[#allocation5 + $0x40] sm:$0xff] }
  0x46   :  { %664 = vmatpush1.bf16.msra.mxu0 %v663_v26  ;;  %v390_v2 = vld [vmem:[#allocation5 + $0x248] sm:$0xff]  ;;  %v392_v3 = vld [vmem:[#allocation5 + $0x258] sm:$0xff]  ;;  %v327_v7 = vld [vmem:[#allocation5 + $0x50] sm:$0xff]  ;;  %v709_v8 = vpack.c.bf16 %v328_v1, %v326_v0 }
  0x47   :  { %696 = vmatpush1.bf16.msra.mxu1 %v695_v27  ;;  %666 = vmatprep.subr.bf16.mxu0 %v665_v30  ;;  %v773_v9 = vpack.c.bf16 %v392_v3, %v390_v2  ;;  %v389_v10 = vld [vmem:[#allocation5 + $0x240] sm:$0xff]  ;;  %v391_v11 = vld [vmem:[#allocation5 + $0x250] sm:$0xff]  ;;  %v330_v12 = vld [vmem:[#allocation5 + $0x68] sm:$0xff]  ;;  %v711_v16 = vpack.c.bf16 %v327_v7, %v325_v6 }
  0x48   :  { %698 = vmatprep.subr.bf16.mxu1 %v697_v31  ;;  %v332_v13 = vld [vmem:[#allocation5 + $0x78] sm:$0xff]  ;;  %v394_v14 = vld [vmem:[#allocation5 + $0x268] sm:$0xff]  ;;  %v775_v17 = vpack.c.bf16 %v391_v11, %v389_v10  ;;  %v329_v18 = vld [vmem:[#allocation5 + $0x60] sm:$0xff] }
  0x49   :  { %v396_v15 = vld [vmem:[#allocation5 + $0x278] sm:$0xff]  ;;  %v331_v19 = vld [vmem:[#allocation5 + $0x70] sm:$0xff]  ;;  %v713_v20 = vpack.c.bf16 %v332_v13, %v330_v12  ;;  %v393_v22 = vld [vmem:[#allocation5 + $0x260] sm:$0xff] }
  0x4a   :  { %668 = vmatpush1.bf16.msra.mxu0 %v667_v38  ;;  %v777_v21 = vpack.c.bf16 %v396_v15, %v394_v14  ;;  %v395_v23 = vld [vmem:[#allocation5 + $0x270] sm:$0xff]  ;;  %v334_v24 = vld [vmem:[#allocation5 + $0x88] sm:$0xff]  ;;  %v336_v25 = vld [vmem:[#allocation5 + $0x98] sm:$0xff]  ;;  %v715_v28 = vpack.c.bf16 %v331_v19, %v329_v18 }
  0x4b   :  { %700 = vmatpush1.bf16.msra.mxu1 %v699_v39  ;;  %766 = vmatprep.subr.bf16.mxu0 %v765_v41  ;;  %v398_v26 = vld [vmem:[#allocation5 + $0x288] sm:$0xff]  ;;  %v400_v27 = vld [vmem:[#allocation5 + $0x298] sm:$0xff]  ;;  %v779_v29 = vpack.c.bf16 %v395_v23, %v393_v22  ;;  %v333_v30 = vld [vmem:[#allocation5 + $0x80] sm:$0xff]  ;;  %v717_v32 = vpack.c.bf16 %v336_v25, %v334_v24 }
  0x4c   :  { %702 = vmatprep.subr.bf16.mxu1 %v701_v40  ;;  %v335_v31 = vld [vmem:[#allocation5 + $0x90] sm:$0xff]  ;;  %v781_v33 = vpack.c.bf16 %v400_v27, %v398_v26  ;;  %v397_v34 = vld [vmem:[#allocation5 + $0x280] sm:$0xff]  ;;  %v338_v36 = vld [vmem:[#allocation5 + $0xa8] sm:$0xff] }
  0x4d   :  { %v399_v35 = vld [vmem:[#allocation5 + $0x290] sm:$0xff]  ;;  %v340_v37 = vld [vmem:[#allocation5 + $0xb8] sm:$0xff]  ;;  %v402_v38 = vld [vmem:[#allocation5 + $0x2a8] sm:$0xff]  ;;  %v719_v40 = vpack.c.bf16 %v335_v31, %v333_v30 }
  0x4e   :  { %v404_v39 = vld [vmem:[#allocation5 + $0x2b8] sm:$0xff]  ;;  %v783_v41 = vpack.c.bf16 %v399_v35, %v397_v34  ;;  %v401_v46 = vld [vmem:[#allocation5 + $0x2a0] sm:$0xff]  ;;  %v342_v48 = vld [vmem:[#allocation5 + $0xc8] sm:$0xff] }
  0x4f   :  { %v785_v45 = vpack.c.bf16 %v404_v39, %v402_v38  ;;  %v344_v49 = vld [vmem:[#allocation5 + $0xd8] sm:$0xff]  ;;  %v406_v50 = vld [vmem:[#allocation5 + $0x2c8] sm:$0xff]  ;;  %v405_v58 = vld [vmem:[#allocation5 + $0x2c0] sm:$0xff] }
  0x50   :  { %v408_v51 = vld [vmem:[#allocation5 + $0x2d8] sm:$0xff]  ;;  %v410_v62 = vld [vmem:[#allocation5 + $0x2e8] sm:$0xff]  ;;  %v345_v2 = vld [vmem:[#allocation5 + $0xe0] sm:$0xff] }
  0x51   :  { %v789_v57 = vpack.c.bf16 %v408_v51, %v406_v50  ;;  %v412_v63 = vld [vmem:[#allocation5 + $0x2f8] sm:$0xff]  ;;  %v347_v3 = vld [vmem:[#allocation5 + $0xf0] sm:$0xff]  ;;  %v409_v6 = vld [vmem:[#allocation5 + $0x2e0] sm:$0xff] }
  0x52   :  { %v411_v7 = vld [vmem:[#allocation5 + $0x2f0] sm:$0xff]  ;;  %v414_v10 = vld [vmem:[#allocation5 + $0x308] sm:$0xff]  ;;  %v416_v11 = vld [vmem:[#allocation5 + $0x318] sm:$0xff]  ;;  %v731_v12 = vpack.c.bf16 %v347_v3, %v345_v2 }
  0x53   :  { %v795_v13 = vpack.c.bf16 %v411_v7, %v409_v6  ;;  %v349_v14 = vld [vmem:[#allocation5 + $0x100] sm:$0xff]  ;;  %v351_v15 = vld [vmem:[#allocation5 + $0x110] sm:$0xff]  ;;  %v418_v22 = vld [vmem:[#allocation5 + $0x328] sm:$0xff] }
  0x54   :  { %v413_v18 = vld [vmem:[#allocation5 + $0x300] sm:$0xff]  ;;  %v415_v19 = vld [vmem:[#allocation5 + $0x310] sm:$0xff]  ;;  %v420_v23 = vld [vmem:[#allocation5 + $0x338] sm:$0xff]  ;;  %v735_v24 = vpack.c.bf16 %v351_v15, %v349_v14 }
  0x55   :  { %v799_v25 = vpack.c.bf16 %v415_v19, %v413_v18  ;;  %v353_v26 = vld [vmem:[#allocation5 + $0x120] sm:$0xff]  ;;  %v355_v27 = vld [vmem:[#allocation5 + $0x130] sm:$0xff]  ;;  %v422_v34 = vld [vmem:[#allocation5 + $0x348] sm:$0xff] }
  0x56   :  { %v417_v30 = vld [vmem:[#allocation5 + $0x320] sm:$0xff]  ;;  %v419_v31 = vld [vmem:[#allocation5 + $0x330] sm:$0xff]  ;;  %v424_v35 = vld [vmem:[#allocation5 + $0x358] sm:$0xff] }
  0x57   :  { %v357_v38 = vld [vmem:[#allocation5 + $0x140] sm:$0xff]  ;;  %v359_v39 = vld [vmem:[#allocation5 + $0x150] sm:$0xff]  ;;  %v434_v6 = vld [vmem:[#allocation5 + $0x3a8] sm:$0xff] }
  0x58   :  { %v361_v50 = vld [vmem:[#allocation5 + $0x160] sm:$0xff]  ;;  %v363_v51 = vld [vmem:[#allocation5 + $0x170] sm:$0xff]  ;;  %v436_v7 = vld [vmem:[#allocation5 + $0x3b8] sm:$0xff] }
  0x59   :  { %v429_v2 = vld [vmem:[#allocation5 + $0x380] sm:$0xff]  ;;  %v431_v3 = vld [vmem:[#allocation5 + $0x390] sm:$0xff]  ;;  %v438_v18 = vld [vmem:[#allocation5 + $0x3c8] sm:$0xff] }
  0x5a   :  { %v433_v14 = vld [vmem:[#allocation5 + $0x3a0] sm:$0xff]  ;;  %v435_v15 = vld [vmem:[#allocation5 + $0x3b0] sm:$0xff]  ;;  %v440_v19 = vld [vmem:[#allocation5 + $0x3d8] sm:$0xff] }
  0xaa   :  { %v67_v44 = vpop.permute.xlu0 %66 }
  0xab   :  { %v75_v47 = vmul.f32 %v634_v42, %v67_v44  ;;  %v337_v42 = vld [vmem:[#allocation5 + $0xa0] sm:$0xff]  ;;  %v721_v44 = vpack.c.bf16 %v340_v37, %v338_v36  ;;  %v739_v36 = vpack.c.bf16 %v355_v27, %v353_v26  ;;  %v803_v37 = vpack.c.bf16 %v419_v31, %v417_v30  ;;  %v378_v30 = vld [vmem:[#allocation5 + $0x1e8] sm:$0xff]  ;;  %v380_v31 = vld [vmem:[#allocation5 + $0x1f8] sm:$0xff] }
  0xac   :  { %v437_v26 = vld [vmem:[#allocation5 + $0x3c0] sm:$0xff] }
  0xad   :  { %v83_v54 = vadd.f32 %v635_v43, %v75_v47  ;;  %v339_v43 = vld [vmem:[#allocation5 + $0xb0] sm:$0xff] }
  0xae   :  { %v403_v47 = vld [vmem:[#allocation5 + $0x2b0] sm:$0xff]  ;;  %v723_v52 = vpack.c.bf16 %v339_v43, %v337_v42  ;;  %v421_v42 = vld [vmem:[#allocation5 + $0x340] sm:$0xff] }
  0xaf   :  { %v84_v59 = vmax.f32 %v83_v54, 0.0  ;;  %v787_v53 = vpack.c.bf16 %v403_v47, %v401_v46  ;;  %v341_v54 = vld [vmem:[#allocation5 + $0xc0] sm:$0xff]  ;;  %v423_v43 = vld [vmem:[#allocation5 + $0x350] sm:$0xff]  ;;  %v426_v46 = vld [vmem:[#allocation5 + $0x368] sm:$0xff] }
  0xb0   :  { %v428_v47 = vld [vmem:[#allocation5 + $0x378] sm:$0xff] }
  0xb1   :  { %236 = vmatmul.mubr.f32.vlgmr.msra.gmra.mrb[0].mxu0 %v84_v59  ;;  %307 = vmatmul.mubr.f32.vlgmr.msra.gmra.mrb[0].mxu1 %v84_v59  ;;  %v407_v59 = vld [vmem:[#allocation5 + $0x2d0] sm:$0xff] }
  0xb2   :  { %704 = vmatpush1.bf16.msra.mxu1 %v703_v55  ;;  %768 = vmatpush1.bf16.msra.mxu0 %v767_v56  ;;  %v343_v55 = vld [vmem:[#allocation5 + $0xd0] sm:$0xff]  ;;  %v725_v56 = vpack.c.bf16 %v344_v49, %v342_v48  ;;  %v791_v1 = vpack.c.bf16 %v407_v59, %v405_v58  ;;  %v743_v48 = vpack.c.bf16 %v359_v39, %v357_v38  ;;  %v430_v58 = vld [vmem:[#allocation5 + $0x388] sm:$0xff]  ;;  %v432_v59 = vld [vmem:[#allocation5 + $0x398] sm:$0xff] }
  0xb3   :  { %706 = vmatprep.subr.bf16.mxu1 %v705_v60  ;;  %770 = vmatprep.subr.bf16.mxu0 %v769_v61  ;;  %v346_v60 = vld [vmem:[#allocation5 + $0xe8] sm:$0xff]  ;;  %v348_v61 = vld [vmem:[#allocation5 + $0xf8] sm:$0xff]  ;;  %v727_v0 = vpack.c.bf16 %v343_v55, %v341_v54  ;;  %v807_v49 = vpack.c.bf16 %v423_v43, %v421_v42  ;;  %v425_v54 = vld [vmem:[#allocation5 + $0x360] sm:$0xff]  ;;  %v151_v42 = vlaneseq }
  0xb4   :  { %v427_v55 = vld [vmem:[#allocation5 + $0x370] sm:$0xff]  ;;  %v441_v39 = vld [vmem:[#allocation5 + $0x3e0] sm:$0xff] }
  0xb5   :  { %v152_v43 = vshrl.u32 %v151_v42, 7 }
  0xb6   :  { %708 = vmatpush1.bf16.msra.mxu1 %v707_v4  ;;  %772 = vmatpush1.bf16.msra.mxu0 %v771_v5  ;;  %v729_v4 = vpack.c.bf16 %v348_v61, %v346_v60  ;;  %v793_v5 = vpack.c.bf16 %v412_v63, %v410_v62  ;;  %v747_v60 = vpack.c.bf16 %v363_v51, %v361_v50  ;;  %v365_v62 = vld [vmem:[#allocation5 + $0x180] sm:$0xff]  ;;  %v367_v63 = vld [vmem:[#allocation5 + $0x190] sm:$0xff] }
  0xb7   :  { %710 = vmatprep.subr.bf16.mxu1 %v709_v8  ;;  %774 = vmatprep.subr.bf16.mxu0 %v773_v9  ;;  %v350_v8 = vld [vmem:[#allocation5 + $0x108] sm:$0xff]  ;;  %v352_v9 = vld [vmem:[#allocation5 + $0x118] sm:$0xff]  ;;  %v811_v61 = vpack.c.bf16 %v427_v55, %v425_v54 }
  0xba   :  { %712 = vmatpush1.bf16.msra.mxu1 %v711_v16  ;;  %776 = vmatpush1.bf16.msra.mxu0 %v775_v17  ;;  %v733_v16 = vpack.c.bf16 %v352_v9, %v350_v8  ;;  %v797_v17 = vpack.c.bf16 %v416_v11, %v414_v10  ;;  %v751_v8 = vpack.c.bf16 %v367_v63, %v365_v62  ;;  %v369_v10 = vld [vmem:[#allocation5 + $0x1a0] sm:$0xff]  ;;  %v371_v11 = vld [vmem:[#allocation5 + $0x1b0] sm:$0xff] }
  0xbb   :  { %714 = vmatprep.subr.bf16.mxu1 %v713_v20  ;;  %778 = vmatprep.subr.bf16.mxu0 %v777_v21  ;;  %v354_v20 = vld [vmem:[#allocation5 + $0x128] sm:$0xff]  ;;  %v356_v21 = vld [vmem:[#allocation5 + $0x138] sm:$0xff]  ;;  %v815_v9 = vpack.c.bf16 %v431_v3, %v429_v2 }
  0xbe   :  { %716 = vmatpush1.bf16.msra.mxu1 %v715_v28  ;;  %780 = vmatpush1.bf16.msra.mxu0 %v779_v29  ;;  %v737_v28 = vpack.c.bf16 %v356_v21, %v354_v20  ;;  %v801_v29 = vpack.c.bf16 %v420_v23, %v418_v22  ;;  %v755_v20 = vpack.c.bf16 %v371_v11, %v369_v10 }
  0xbf   :  { %718 = vmatprep.subr.bf16.mxu1 %v717_v32  ;;  %782 = vmatprep.subr.bf16.mxu0 %v781_v33  ;;  %v358_v32 = vld [vmem:[#allocation5 + $0x148] sm:$0xff]  ;;  %v360_v33 = vld [vmem:[#allocation5 + $0x158] sm:$0xff]  ;;  %v819_v21 = vpack.c.bf16 %v435_v15, %v433_v14  ;;  %v821_v23 = vpack.c.bf16 %v440_v19, %v438_v18 }
  0xc2   :  { %720 = vmatpush1.bf16.msra.mxu1 %v719_v40  ;;  %784 = vmatpush1.bf16.msra.mxu0 %v783_v41  ;;  %v741_v40 = vpack.c.bf16 %v360_v33, %v358_v32  ;;  %v805_v41 = vpack.c.bf16 %v424_v35, %v422_v34  ;;  %v442_v32 = vld [vmem:[#allocation5 + $0x3e8] sm:$0xff]  ;;  %v761_v33 = vpack.c.bf16 %v380_v31, %v378_v30  ;;  %v444_v34 = vld [vmem:[#allocation5 + $0x3f8] sm:$0xff]  ;;  %v377_v35 = vld [vmem:[#allocation5 + $0x1e0] sm:$0xff] }
  0xc3   :  { %722 = vmatprep.subr.bf16.mxu1 %v721_v44  ;;  %786 = vmatprep.subr.bf16.mxu0 %v785_v45  ;;  %v362_v44 = vld [vmem:[#allocation5 + $0x168] sm:$0xff]  ;;  %v364_v45 = vld [vmem:[#allocation5 + $0x178] sm:$0xff] }
  0xc6   :  { %724 = vmatpush1.bf16.msra.mxu1 %v723_v52  ;;  %788 = vmatpush1.bf16.msra.mxu0 %v787_v53  ;;  %v745_v52 = vpack.c.bf16 %v364_v45, %v362_v44  ;;  %v809_v53 = vpack.c.bf16 %v428_v47, %v426_v46  ;;  %v153_v44 = vsub.s32 0, %v152_v43  ;;  %v161_v45 = vsub.s32 2, %v152_v43  ;;  %v149_v46 = vld [vmem:[%s1000_s4] sm:$0xf] }
  0xc7   :  { %726 = vmatprep.subr.bf16.mxu1 %v725_v56  ;;  %790 = vmatprep.subr.bf16.mxu0 %v789_v57  ;;  %v366_v56 = vld [vmem:[#allocation5 + $0x188] sm:$0xff]  ;;  %v368_v57 = vld [vmem:[#allocation5 + $0x198] sm:$0xff]  ;;  %v157_v47 = vsub.s32 1, %v152_v43 }
  0xc8   :  { %v162_v50 = vrot.slane %v149_v46, %v161_v45 }
  0xc9   :  { %v158_v51 = vrot.slane %v149_v46, %v157_v47 }
  0xca   :  { %728 = vmatpush1.bf16.msra.mxu1 %v727_v0  ;;  %792 = vmatpush1.bf16.msra.mxu0 %v791_v1  ;;  %v749_v0 = vpack.c.bf16 %v368_v57, %v366_v56  ;;  %v813_v1 = vpack.c.bf16 %v432_v59, %v430_v58 }
  0xcb   :  { %730 = vmatprep.subr.bf16.mxu1 %v729_v4  ;;  %794 = vmatprep.subr.bf16.mxu0 %v793_v5  ;;  %v370_v4 = vld [vmem:[#allocation5 + $0x1a8] sm:$0xff]  ;;  %v372_v5 = vld [vmem:[#allocation5 + $0x1b8] sm:$0xff] }
  0xce   :  { %732 = vmatpush1.bf16.msra.mxu1 %v731_v12  ;;  %796 = vmatpush1.bf16.msra.mxu0 %v795_v13  ;;  %v753_v12 = vpack.c.bf16 %v372_v5, %v370_v4  ;;  %v817_v13 = vpack.c.bf16 %v436_v7, %v434_v6  ;;  %v601_v6 = vld [vmem:[%s1003_s7] sm:$0x3] }
  0xcf   :  { %734 = vmatprep.subr.bf16.mxu1 %v733_v16  ;;  %798 = vmatprep.subr.bf16.mxu0 %v797_v17  ;;  %v374_v16 = vld [vmem:[#allocation5 + $0x1c8] sm:$0xff]  ;;  %v376_v17 = vld [vmem:[#allocation5 + $0x1d8] sm:$0xff]  ;;  %v610_v14 = vrot.slane %v601_v6, %v157_v47 }
  0xd0   :  { %v757_v22 = vpack.c.bf16 %v376_v17, %v374_v16 }
  0xd2   :  { %736 = vmatpush1.bf16.msra.mxu1 %v735_v24  ;;  %800 = vmatpush1.bf16.msra.mxu0 %v799_v25  ;;  %v373_v24 = vld [vmem:[#allocation5 + $0x1c0] sm:$0xff]  ;;  %v375_v25 = vld [vmem:[#allocation5 + $0x1d0] sm:$0xff] }
  0xd3   :  { %738 = vmatprep.subr.bf16.mxu1 %v737_v28  ;;  %802 = vmatprep.subr.bf16.mxu0 %v801_v29  ;;  %v759_v27 = vpack.c.bf16 %v375_v25, %v373_v24  ;;  %v439_v28 = vld [vmem:[#allocation5 + $0x3d0] sm:$0xff] }
  0xd4   :  { %v823_v29 = vpack.c.bf16 %v439_v28, %v437_v26 }
  0xd6   :  { %740 = vmatpush1.bf16.msra.mxu1 %v739_v36  ;;  %804 = vmatpush1.bf16.msra.mxu0 %v803_v37  ;;  %v379_v36 = vld [vmem:[#allocation5 + $0x1f0] sm:$0xff]  ;;  %v825_v37 = vpack.c.bf16 %v444_v34, %v442_v32 }
  0xd7   :  { %742 = vmatprep.subr.bf16.mxu1 %v741_v40  ;;  %806 = vmatprep.subr.bf16.mxu0 %v805_v41  ;;  %v763_v38 = vpack.c.bf16 %v379_v36, %v377_v35  ;;  %v443_v40 = vld [vmem:[#allocation5 + $0x3f0] sm:$0xff] }
  0xd8   :  { %v827_v41 = vpack.c.bf16 %v443_v40, %v441_v39 }
  0xda   :  { %744 = vmatpush1.bf16.msra.mxu1 %v743_v48  ;;  %808 = vmatpush1.bf16.msra.mxu0 %v807_v49  ;;  %v165_v48 = vsub.s32 3, %v152_v43  ;;  %v154_v49 = vrot.slane %v149_v46, %v153_v44 }
  0xdb   :  { %746 = vmatprep.subr.bf16.mxu1 %v745_v52  ;;  %810 = vmatprep.subr.bf16.mxu0 %v809_v53 }
  0xdc   :  { %v166_v52 = vrot.slane %v149_v46, %v165_v48 }
  0xde   :  { %748 = vmatpush1.bf16.msra.mxu1 %v747_v60  ;;  %812 = vmatpush1.bf16.msra.mxu0 %v811_v61 }
  0xdf   :  { %750 = vmatprep.subr.bf16.mxu1 %v749_v0  ;;  %814 = vmatprep.subr.bf16.mxu0 %v813_v1  ;;  %v445_v1 = vld [vmem:[%s1002_s6] sm:$0x3] }
  0xe0   :  { %v450_v2 = vrot.slane %v445_v1, %v153_v44  ;;  %v454_v3 = vrot.slane %v445_v1, %v157_v47 }
  0xe2   :  { %752 = vmatpush1.bf16.msra.mxu1 %v751_v8  ;;  %816 = vmatpush1.bf16.msra.mxu0 %v815_v9 }
  0xe3   :  { %754 = vmatprep.subr.bf16.mxu1 %v753_v12  ;;  %818 = vmatprep.subr.bf16.mxu0 %v817_v13  ;;  %v606_v12 = vrot.slane %v601_v6, %v153_v44 }
  0xe6   :  { %756 = vmatpush1.bf16.msra.mxu1 %v755_v20  ;;  %820 = vmatpush1.bf16.msra.mxu0 %v819_v21  ;;  %v636_v20 = vld [vmem:[#allocation2] ss:$0 sm:$0xff] }
  0xe7   :  { %758 = vmatprep.subr.bf16.mxu1 %v757_v22  ;;  %822 = vmatprep.subr.bf16.mxu0 %v821_v23 }
  0xea   :  { %760 = vmatpush1.bf16.msra.mxu1 %v759_v27  ;;  %824 = vmatpush1.bf16.msra.mxu0 %v823_v29 }
  0xeb   :  { %762 = vmatprep.subr.bf16.mxu1 %v761_v33  ;;  %826 = vmatprep.subr.bf16.mxu0 %v825_v37 }
  0xee   :  { %764 = vmatpush1.bf16.msra.mxu1 %v763_v38  ;;  %828 = vmatpush1.bf16.msra.mxu0 %v827_v41 }
 0x184   :  { %v237_v53 = vpop.f32.mrb[0].mxu0  ;;  %v308_v54 = vpop.f32.mrb[0].mxu1 }
 0x185   :  { %v238_v55 = vadd.f32 %v237_v53, %v154_v49  ;;  %v309_v56 = vadd.f32 %v308_v54, %v162_v50  ;;  %v239_v57 = vpop.f32.mrb[1].mxu0  ;;  %v310_v58 = vpop.f32.mrb[1].mxu1 }
 0x186   :  { %v240_v59 = vadd.f32 %v239_v57, %v158_v51  ;;  %v311_v60 = vadd.f32 %v310_v58, %v166_v52 }
 0x187   :  { %v313_v63 = vmax.f32 %v238_v55, 0.0  ;;  %v315_v0 = vmax.f32 %v309_v56, 0.0 }
 0x188   :  { %v314_v61 = vmax.f32 %v240_v59, 0.0  ;;  %v316_v62 = vmax.f32 %v311_v60, 0.0 }
 0x18a   :  { %521 = vmatprep.mubr.f32.mxu1 %v314_v61  ;;  %592 = vmatprep.mubr.f32.mxu0 %v316_v62 }
 0x18b   :  { %522 = vmatmul.mubr.f32.vlgmr.msra.gmra.mrb[2].mxu1 %v313_v63  ;;  %593 = vmatmul.mubr.f32.vlgmr.msra.gmra.mrb[2].mxu0 %v315_v0 }
 0x25e   :  { %v523_v4 = vpop.f32.mrb[2].mxu1  ;;  %v594_v5 = vpop.f32.mrb[2].mxu0 }
 0x25f   :  { %v524_v7 = vadd.f32 %v523_v4, %v450_v2  ;;  %v525_v8 = vpop.f32.mrb[3].mxu1  ;;  %v596_v9 = vpop.f32.mrb[3].mxu0 }
 0x260   :  { %v526_v10 = vadd.f32 %v525_v8, %v454_v3 }
 0x261   :  { %v595_v11 = vadd.f32 %v594_v5, %v524_v7 }
 0x262   :  { %v597_v13 = vadd.f32 %v596_v9, %v526_v10 }
 0x263   :  { %v599_v15 = vmax.f32 %v595_v11, 0.0 }
 0x264   :  { %v600_v16 = vmax.f32 %v597_v13, 0.0 }
 0x265   :  { %v613_v17 = vmul.f32 %v606_v12, %v599_v15 }
 0x266   :  { %v614_v18 = vmul.f32 %v610_v14, %v600_v16 }
 0x268   :  { %v615_v19 = vadd.f32 %v614_v18, %v613_v17 }
 0x26a   :  { %616 = vadd.xlane.f32.xlu0 %v615_v19 }
 0x2f7   :  { %v617_v21 = vpop.xlane.xlu0 %616 }
 0x2f8   :  { %v625_v22 = vadd.f32 %v636_v20, %v617_v21 }
 0x2fa   :  { %627 = vst.msk [vmem:[%s1005_s9] sm:$0xff] %vm626_vm0, %v625_v22 }
 0x2fb   :  { %632 = vsyncpa [#allocation4], 1 }
 0x2fc   :  { %633 = vsyncpa [#allocation6], 1 }

</bundles_post_ra>
